<compile_context>
chip_gen: v6e
topology: v6e:2x2x1
jax: 0.10.0
libtpu: 0.0.40
codegen_flags: <defaults>
</compile_context>

<pallas_src>
import jax
import jax.numpy as jnp
from jax.experimental import pallas as pl
from jax.experimental.pallas import tpu as pltpu


# ----------------------------- configuration -----------------------------
OBS_LEN = 8
PRED_LEN = 8
TRAJ_LEN = OBS_LEN + PRED_LEN          # 16
FEAT_DIMS = 2
ENC_DIM = 16
HIDDEN = (32, 64, 32)
BATCH = 8

LF = TRAJ_LEN * FEAT_DIMS              # 32 (flattened trajectory width)
PAD = 128                              # lane-dense padded feature width
N_LAYERS = 12

TRAJ_ENCODER_DIMS = [(LF, HIDDEN[0]), (HIDDEN[0], HIDDEN[1]),
                     (HIDDEN[1], HIDDEN[2]), (HIDDEN[2], ENC_DIM)]
ENCODER_DIMS = [(ENC_DIM + FEAT_DIMS, HIDDEN[0]), (HIDDEN[0], HIDDEN[1]),
                (HIDDEN[1], HIDDEN[2]), (HIDDEN[2], ENC_DIM)]
DECODER_DIMS = [(ENC_DIM, HIDDEN[0]), (HIDDEN[0], HIDDEN[1]),
                (HIDDEN[1], HIDDEN[2]), (HIDDEN[2], LF)]
ALL_DIMS = TRAJ_ENCODER_DIMS + ENCODER_DIMS + DECODER_DIMS   # 12 layers


def _round_up(x, m):
    return (x + m - 1) // m * m


# ------------------------------ Pallas kernel -----------------------------
def ae_kernel(traj_ref, pos_ref, w_ref, b_ref, out_ref):
    """All 12 Linear+ReLU layers of the AE on one (TB, 128) row tile.

    w_ref: (12, 128, 128) zero-padded weight slab; b_ref: (12, 1, 128) biases.
    Zero padding of weight columns/biases keeps the unused lanes of every
    ReLU activation exactly zero, so the padded matmuls are exact.
    """
    x = traj_ref[...]                                            # (TB, PAD)

    # --- traj_encoder: layers 0..3 ---
    for i in range(4):
        x = jnp.maximum(
            jnp.dot(x, w_ref[i], preferred_element_type=jnp.float32)
            + b_ref[i], 0.0)

    # --- concat([traj_enc, init_pos], -1) as a VPU add ---
    # pos arrives pre-placed in lanes [ENC_DIM : ENC_DIM+FEAT_DIMS], where x
    # is exactly zero, so this add IS the lane-concat; encoder layer 0 is a
    # single fused matmul against the 18-row (padded) weight block.
    x = x + pos_ref[...]

    # --- encoder: layers 4..7 ---
    for i in range(4, 8):
        x = jnp.maximum(
            jnp.dot(x, w_ref[i], preferred_element_type=jnp.float32)
            + b_ref[i], 0.0)

    # --- decoder: layers 8..11 ---
    for i in range(8, 12):
        x = jnp.maximum(
            jnp.dot(x, w_ref[i], preferred_element_type=jnp.float32)
            + b_ref[i], 0.0)

    out_ref[...] = x.astype(out_ref.dtype)       # lane-dense full-tile store


# ------------------------------ param packing -----------------------------
def pack_params(params):
    """Pack 12 (W, b) pairs into two padded slabs (done once, outside jit)."""
    w_slab = jnp.zeros((N_LAYERS, PAD, PAD), jnp.float32)
    b_slab = jnp.zeros((N_LAYERS, 1, PAD), jnp.float32)
    for i, (w, b) in enumerate(params):
        din, dout = w.shape
        w_slab = w_slab.at[i, :din, :dout].set(w.astype(jnp.float32))
        b_slab = b_slab.at[i, 0, :dout].set(b.reshape(-1).astype(jnp.float32))
    return w_slab, b_slab


# ------------------------------ wrapper ----------------------------------
@jax.jit
def ae_forward(traj, init_pos, w_slab, b_slab):
    """traj: (B, TRAJ_LEN, FEAT_DIMS), init_pos: (B, 1, FEAT_DIMS)."""
    B = traj.shape[0]
    TB = min(_round_up(B, 8), 256)            # row tile (sublane multiple)
    B_pad = _round_up(B, TB)

    traj2d = traj.reshape(B, LF).astype(jnp.float32)
    pos2d = init_pos.reshape(B, FEAT_DIMS).astype(jnp.float32)

    # Lane-dense padded inputs; pos goes straight into its concat lanes.
    traj_pad = jnp.zeros((B_pad, PAD), jnp.float32).at[:B, :LF].set(traj2d)
    pos_pad = jnp.zeros((B_pad, PAD), jnp.float32).at[
        :B, ENC_DIM:ENC_DIM + FEAT_DIMS].set(pos2d)

    grid = (B_pad // TB,)

    out = pl.pallas_call(
        ae_kernel,
        out_shape=jax.ShapeDtypeStruct((B_pad, PAD), jnp.float32),
        grid=grid,
        in_specs=[
            pl.BlockSpec((TB, PAD), lambda i: (i, 0)),              # traj tile
            pl.BlockSpec((TB, PAD), lambda i: (i, 0)),              # pos tile
            pl.BlockSpec((N_LAYERS, PAD, PAD), lambda i: (0, 0, 0)),  # weights
            pl.BlockSpec((N_LAYERS, 1, PAD), lambda i: (0, 0, 0)),    # biases
        ],
        out_specs=pl.BlockSpec((TB, PAD), lambda i: (i, 0)),
        compiler_params=pltpu.CompilerParams(
            dimension_semantics=("parallel",)),   # shards batch across TCs (v7x)
    )(traj_pad, pos_pad, w_slab, b_slab)

    rec = out[:B, :LF].reshape(B, TRAJ_LEN, FEAT_DIMS)
    return {"rec": rec}


# -------------------------- deterministic params --------------------------
def init_params(key):
    params = []
    for li, (din, dout) in enumerate(ALL_DIMS):
        kw, kb = jax.random.split(jax.random.fold_in(key, li))
        w = jax.random.normal(kw, (din, dout), jnp.float32) * (1.0 / jnp.sqrt(din))
        b = jax.random.normal(kb, (dout,), jnp.float32) * 0.01
        params.append((w, b))
    return params


# ------------------------------ reference ---------------------------------
def ae_reference(traj, init_pos, params):
    B = traj.shape[0]
    x = traj.reshape(B, LF).astype(jnp.float32)
    pos = init_pos.reshape(B, FEAT_DIMS).astype(jnp.float32)

    def mlp(x, w, b):
        return jnp.maximum(x @ w + b, 0.0)

    for i in range(4):
        x = mlp(x, *params[i])
    x = jnp.concatenate([x, pos], axis=-1)
    for i in range(4, 8):
        x = mlp(x, *params[i])
    for i in range(8, 12):
        x = mlp(x, *params[i])
    return x.reshape(B, TRAJ_LEN, FEAT_DIMS)


# -------------------------------- main ------------------------------------
if __name__ == "__main__":
    key = jax.random.PRNGKey(0)
    k_traj, k_pos, k_par = jax.random.split(key, 3)

    traj = jax.random.normal(k_traj, (BATCH, TRAJ_LEN, FEAT_DIMS), jnp.float32)
    init_pos = jax.random.normal(k_pos, (BATCH, 1, FEAT_DIMS), jnp.float32)
    params = init_params(k_par)
    w_slab, b_slab = pack_params(params)      # packed once, reused every call

    out = ae_forward(traj, init_pos, w_slab, b_slab)
    rec = jax.block_until_ready(out["rec"])

    ref = ae_reference(traj, init_pos, params)
    assert rec.shape == (BATCH, TRAJ_LEN, FEAT_DIMS)
    assert jnp.allclose(rec, ref, atol=2e-4, rtol=2e-4), "mismatch vs reference"

    print("KERNEL_OK")
</pallas_src>

<mosaic_0001>
module attributes {stable_mosaic.version = 11 : i64} {
  func.func @ae_kernel(%arg0: i32, %arg1: memref<8x128xf32, #tpu.memory_space<vmem>>, %arg2: memref<8x128xf32, #tpu.memory_space<vmem>>, %arg3: memref<12x128x128xf32, #tpu.memory_space<vmem>>, %arg4: memref<12x1x128xf32, #tpu.memory_space<vmem>>, %arg5: memref<8x128xf32, #tpu.memory_space<vmem>>) attributes {dimension_semantics = [#tpu.dimension_semantics<parallel>], iteration_bounds = array<i64: 1>, scalar_prefetch = 0 : i64, scratch_operands = 0 : i64, tpu.core_type = #tpu.core_type<tc>, window_params = [{transform_indices = @transform_0, window_bounds = array<i64: 8, 128>}, {transform_indices = @transform_1, window_bounds = array<i64: 8, 128>}, {pipeline_mode = #tpu.pipeline_mode<synchronous>, transform_indices = @transform_2, window_bounds = array<i64: 12, 128, 128>}, {pipeline_mode = #tpu.pipeline_mode<synchronous>, transform_indices = @transform_3, window_bounds = array<i64: 12, 1, 128>}, {transform_indices = @transform_4, window_bounds = array<i64: 8, 128>}]} {
    %c0 = arith.constant 0 : index
    %c0_0 = arith.constant 0 : index
    %0 = vector.load %arg1[%c0, %c0_0] : memref<8x128xf32, #tpu.memory_space<vmem>>, vector<8x128xf32>
    %c0_1 = arith.constant 0 : index
    %c0_2 = arith.constant 0 : index
    %c0_3 = arith.constant 0 : index
    %1 = vector.load %arg3[%c0_1, %c0_2, %c0_3] : memref<12x128x128xf32, #tpu.memory_space<vmem>>, vector<1x128x128xf32>
    %2 = vector.shape_cast %1 : vector<1x128x128xf32> to vector<128x128xf32>
    %cst = arith.constant dense<0.000000e+00> : vector<8x128xf32>
    %3 = tpu.matmul %0, %2, %cst {dimension_numbers = #tpu.dot_dimension_numbers<[1], [0], [0], [1], [0, 0, 1, 1], [], []>} : vector<8x128xf32>, vector<128x128xf32>, vector<8x128xf32> -> vector<8x128xf32>
    %c0_4 = arith.constant 0 : index
    %c0_5 = arith.constant 0 : index
    %c0_6 = arith.constant 0 : index
    %4 = vector.load %arg4[%c0_4, %c0_5, %c0_6] : memref<12x1x128xf32, #tpu.memory_space<vmem>>, vector<1x1x128xf32>
    %5 = vector.shape_cast %4 : vector<1x1x128xf32> to vector<1x128xf32>
    %6 = vector.broadcast %5 : vector<1x128xf32> to vector<8x128xf32>
    %7 = arith.addf %3, %6 : vector<8x128xf32>
    %cst_7 = arith.constant 0.000000e+00 : f32
    %8 = vector.broadcast %cst_7 : f32 to vector<8x128xf32>
    %9 = arith.maximumf %7, %8 : vector<8x128xf32>
    %c1 = arith.constant 1 : index
    %c0_8 = arith.constant 0 : index
    %c0_9 = arith.constant 0 : index
    %10 = vector.load %arg3[%c1, %c0_8, %c0_9] : memref<12x128x128xf32, #tpu.memory_space<vmem>>, vector<1x128x128xf32>
    %11 = vector.shape_cast %10 : vector<1x128x128xf32> to vector<128x128xf32>
    %cst_10 = arith.constant dense<0.000000e+00> : vector<8x128xf32>
    %12 = tpu.matmul %9, %11, %cst_10 {dimension_numbers = #tpu.dot_dimension_numbers<[1], [0], [0], [1], [0, 0, 1, 1], [], []>} : vector<8x128xf32>, vector<128x128xf32>, vector<8x128xf32> -> vector<8x128xf32>
    %c1_11 = arith.constant 1 : index
    %c0_12 = arith.constant 0 : index
    %c0_13 = arith.constant 0 : index
    %13 = vector.load %arg4[%c1_11, %c0_12, %c0_13] : memref<12x1x128xf32, #tpu.memory_space<vmem>>, vector<1x1x128xf32>
    %14 = vector.shape_cast %13 : vector<1x1x128xf32> to vector<1x128xf32>
    %15 = vector.broadcast %14 : vector<1x128xf32> to vector<8x128xf32>
    %16 = arith.addf %12, %15 : vector<8x128xf32>
    %cst_14 = arith.constant 0.000000e+00 : f32
    %17 = vector.broadcast %cst_14 : f32 to vector<8x128xf32>
    %18 = arith.maximumf %16, %17 : vector<8x128xf32>
    %c2 = arith.constant 2 : index
    %c0_15 = arith.constant 0 : index
    %c0_16 = arith.constant 0 : index
    %19 = vector.load %arg3[%c2, %c0_15, %c0_16] : memref<12x128x128xf32, #tpu.memory_space<vmem>>, vector<1x128x128xf32>
    %20 = vector.shape_cast %19 : vector<1x128x128xf32> to vector<128x128xf32>
    %cst_17 = arith.constant dense<0.000000e+00> : vector<8x128xf32>
    %21 = tpu.matmul %18, %20, %cst_17 {dimension_numbers = #tpu.dot_dimension_numbers<[1], [0], [0], [1], [0, 0, 1, 1], [], []>} : vector<8x128xf32>, vector<128x128xf32>, vector<8x128xf32> -> vector<8x128xf32>
    %c2_18 = arith.constant 2 : index
    %c0_19 = arith.constant 0 : index
    %c0_20 = arith.constant 0 : index
    %22 = vector.load %arg4[%c2_18, %c0_19, %c0_20] : memref<12x1x128xf32, #tpu.memory_space<vmem>>, vector<1x1x128xf32>
    %23 = vector.shape_cast %22 : vector<1x1x128xf32> to vector<1x128xf32>
    %24 = vector.broadcast %23 : vector<1x128xf32> to vector<8x128xf32>
    %25 = arith.addf %21, %24 : vector<8x128xf32>
    %cst_21 = arith.constant 0.000000e+00 : f32
    %26 = vector.broadcast %cst_21 : f32 to vector<8x128xf32>
    %27 = arith.maximumf %25, %26 : vector<8x128xf32>
    %c3 = arith.constant 3 : index
    %c0_22 = arith.constant 0 : index
    %c0_23 = arith.constant 0 : index
    %28 = vector.load %arg3[%c3, %c0_22, %c0_23] : memref<12x128x128xf32, #tpu.memory_space<vmem>>, vector<1x128x128xf32>
    %29 = vector.shape_cast %28 : vector<1x128x128xf32> to vector<128x128xf32>
    %cst_24 = arith.constant dense<0.000000e+00> : vector<8x128xf32>
    %30 = tpu.matmul %27, %29, %cst_24 {dimension_numbers = #tpu.dot_dimension_numbers<[1], [0], [0], [1], [0, 0, 1, 1], [], []>} : vector<8x128xf32>, vector<128x128xf32>, vector<8x128xf32> -> vector<8x128xf32>
    %c3_25 = arith.constant 3 : index
    %c0_26 = arith.constant 0 : index
    %c0_27 = arith.constant 0 : index
    %31 = vector.load %arg4[%c3_25, %c0_26, %c0_27] : memref<12x1x128xf32, #tpu.memory_space<vmem>>, vector<1x1x128xf32>
    %32 = vector.shape_cast %31 : vector<1x1x128xf32> to vector<1x128xf32>
    %33 = vector.broadcast %32 : vector<1x128xf32> to vector<8x128xf32>
    %34 = arith.addf %30, %33 : vector<8x128xf32>
    %cst_28 = arith.constant 0.000000e+00 : f32
    %35 = vector.broadcast %cst_28 : f32 to vector<8x128xf32>
    %36 = arith.maximumf %34, %35 : vector<8x128xf32>
    %c0_29 = arith.constant 0 : index
    %c0_30 = arith.constant 0 : index
    %37 = vector.load %arg2[%c0_29, %c0_30] : memref<8x128xf32, #tpu.memory_space<vmem>>, vector<8x128xf32>
    %38 = arith.addf %36, %37 : vector<8x128xf32>
    %c4 = arith.constant 4 : index
    %c0_31 = arith.constant 0 : index
    %c0_32 = arith.constant 0 : index
    %39 = vector.load %arg3[%c4, %c0_31, %c0_32] : memref<12x128x128xf32, #tpu.memory_space<vmem>>, vector<1x128x128xf32>
    %40 = vector.shape_cast %39 : vector<1x128x128xf32> to vector<128x128xf32>
    %cst_33 = arith.constant dense<0.000000e+00> : vector<8x128xf32>
    %41 = tpu.matmul %38, %40, %cst_33 {dimension_numbers = #tpu.dot_dimension_numbers<[1], [0], [0], [1], [0, 0, 1, 1], [], []>} : vector<8x128xf32>, vector<128x128xf32>, vector<8x128xf32> -> vector<8x128xf32>
    %c4_34 = arith.constant 4 : index
    %c0_35 = arith.constant 0 : index
    %c0_36 = arith.constant 0 : index
    %42 = vector.load %arg4[%c4_34, %c0_35, %c0_36] : memref<12x1x128xf32, #tpu.memory_space<vmem>>, vector<1x1x128xf32>
    %43 = vector.shape_cast %42 : vector<1x1x128xf32> to vector<1x128xf32>
    %44 = vector.broadcast %43 : vector<1x128xf32> to vector<8x128xf32>
    %45 = arith.addf %41, %44 : vector<8x128xf32>
    %cst_37 = arith.constant 0.000000e+00 : f32
    %46 = vector.broadcast %cst_37 : f32 to vector<8x128xf32>
    %47 = arith.maximumf %45, %46 : vector<8x128xf32>
    %c5 = arith.constant 5 : index
    %c0_38 = arith.constant 0 : index
    %c0_39 = arith.constant 0 : index
    %48 = vector.load %arg3[%c5, %c0_38, %c0_39] : memref<12x128x128xf32, #tpu.memory_space<vmem>>, vector<1x128x128xf32>
    %49 = vector.shape_cast %48 : vector<1x128x128xf32> to vector<128x128xf32>
    %cst_40 = arith.constant dense<0.000000e+00> : vector<8x128xf32>
    %50 = tpu.matmul %47, %49, %cst_40 {dimension_numbers = #tpu.dot_dimension_numbers<[1], [0], [0], [1], [0, 0, 1, 1], [], []>} : vector<8x128xf32>, vector<128x128xf32>, vector<8x128xf32> -> vector<8x128xf32>
    %c5_41 = arith.constant 5 : index
    %c0_42 = arith.constant 0 : index
    %c0_43 = arith.constant 0 : index
    %51 = vector.load %arg4[%c5_41, %c0_42, %c0_43] : memref<12x1x128xf32, #tpu.memory_space<vmem>>, vector<1x1x128xf32>
    %52 = vector.shape_cast %51 : vector<1x1x128xf32> to vector<1x128xf32>
    %53 = vector.broadcast %52 : vector<1x128xf32> to vector<8x128xf32>
    %54 = arith.addf %50, %53 : vector<8x128xf32>
    %cst_44 = arith.constant 0.000000e+00 : f32
    %55 = vector.broadcast %cst_44 : f32 to vector<8x128xf32>
    %56 = arith.maximumf %54, %55 : vector<8x128xf32>
    %c6 = arith.constant 6 : index
    %c0_45 = arith.constant 0 : index
    %c0_46 = arith.constant 0 : index
    %57 = vector.load %arg3[%c6, %c0_45, %c0_46] : memref<12x128x128xf32, #tpu.memory_space<vmem>>, vector<1x128x128xf32>
    %58 = vector.shape_cast %57 : vector<1x128x128xf32> to vector<128x128xf32>
    %cst_47 = arith.constant dense<0.000000e+00> : vector<8x128xf32>
    %59 = tpu.matmul %56, %58, %cst_47 {dimension_numbers = #tpu.dot_dimension_numbers<[1], [0], [0], [1], [0, 0, 1, 1], [], []>} : vector<8x128xf32>, vector<128x128xf32>, vector<8x128xf32> -> vector<8x128xf32>
    %c6_48 = arith.constant 6 : index
    %c0_49 = arith.constant 0 : index
    %c0_50 = arith.constant 0 : index
    %60 = vector.load %arg4[%c6_48, %c0_49, %c0_50] : memref<12x1x128xf32, #tpu.memory_space<vmem>>, vector<1x1x128xf32>
    %61 = vector.shape_cast %60 : vector<1x1x128xf32> to vector<1x128xf32>
    %62 = vector.broadcast %61 : vector<1x128xf32> to vector<8x128xf32>
    %63 = arith.addf %59, %62 : vector<8x128xf32>
    %cst_51 = arith.constant 0.000000e+00 : f32
    %64 = vector.broadcast %cst_51 : f32 to vector<8x128xf32>
    %65 = arith.maximumf %63, %64 : vector<8x128xf32>
    %c7 = arith.constant 7 : index
    %c0_52 = arith.constant 0 : index
    %c0_53 = arith.constant 0 : index
    %66 = vector.load %arg3[%c7, %c0_52, %c0_53] : memref<12x128x128xf32, #tpu.memory_space<vmem>>, vector<1x128x128xf32>
    %67 = vector.shape_cast %66 : vector<1x128x128xf32> to vector<128x128xf32>
    %cst_54 = arith.constant dense<0.000000e+00> : vector<8x128xf32>
    %68 = tpu.matmul %65, %67, %cst_54 {dimension_numbers = #tpu.dot_dimension_numbers<[1], [0], [0], [1], [0, 0, 1, 1], [], []>} : vector<8x128xf32>, vector<128x128xf32>, vector<8x128xf32> -> vector<8x128xf32>
    %c7_55 = arith.constant 7 : index
    %c0_56 = arith.constant 0 : index
    %c0_57 = arith.constant 0 : index
    %69 = vector.load %arg4[%c7_55, %c0_56, %c0_57] : memref<12x1x128xf32, #tpu.memory_space<vmem>>, vector<1x1x128xf32>
    %70 = vector.shape_cast %69 : vector<1x1x128xf32> to vector<1x128xf32>
    %71 = vector.broadcast %70 : vector<1x128xf32> to vector<8x128xf32>
    %72 = arith.addf %68, %71 : vector<8x128xf32>
    %cst_58 = arith.constant 0.000000e+00 : f32
    %73 = vector.broadcast %cst_58 : f32 to vector<8x128xf32>
    %74 = arith.maximumf %72, %73 : vector<8x128xf32>
    %c8 = arith.constant 8 : index
    %c0_59 = arith.constant 0 : index
    %c0_60 = arith.constant 0 : index
    %75 = vector.load %arg3[%c8, %c0_59, %c0_60] : memref<12x128x128xf32, #tpu.memory_space<vmem>>, vector<1x128x128xf32>
    %76 = vector.shape_cast %75 : vector<1x128x128xf32> to vector<128x128xf32>
    %cst_61 = arith.constant dense<0.000000e+00> : vector<8x128xf32>
    %77 = tpu.matmul %74, %76, %cst_61 {dimension_numbers = #tpu.dot_dimension_numbers<[1], [0], [0], [1], [0, 0, 1, 1], [], []>} : vector<8x128xf32>, vector<128x128xf32>, vector<8x128xf32> -> vector<8x128xf32>
    %c8_62 = arith.constant 8 : index
    %c0_63 = arith.constant 0 : index
    %c0_64 = arith.constant 0 : index
    %78 = vector.load %arg4[%c8_62, %c0_63, %c0_64] : memref<12x1x128xf32, #tpu.memory_space<vmem>>, vector<1x1x128xf32>
    %79 = vector.shape_cast %78 : vector<1x1x128xf32> to vector<1x128xf32>
    %80 = vector.broadcast %79 : vector<1x128xf32> to vector<8x128xf32>
    %81 = arith.addf %77, %80 : vector<8x128xf32>
    %cst_65 = arith.constant 0.000000e+00 : f32
    %82 = vector.broadcast %cst_65 : f32 to vector<8x128xf32>
    %83 = arith.maximumf %81, %82 : vector<8x128xf32>
    %c9 = arith.constant 9 : index
    %c0_66 = arith.constant 0 : index
    %c0_67 = arith.constant 0 : index
    %84 = vector.load %arg3[%c9, %c0_66, %c0_67] : memref<12x128x128xf32, #tpu.memory_space<vmem>>, vector<1x128x128xf32>
    %85 = vector.shape_cast %84 : vector<1x128x128xf32> to vector<128x128xf32>
    %cst_68 = arith.constant dense<0.000000e+00> : vector<8x128xf32>
    %86 = tpu.matmul %83, %85, %cst_68 {dimension_numbers = #tpu.dot_dimension_numbers<[1], [0], [0], [1], [0, 0, 1, 1], [], []>} : vector<8x128xf32>, vector<128x128xf32>, vector<8x128xf32> -> vector<8x128xf32>
    %c9_69 = arith.constant 9 : index
    %c0_70 = arith.constant 0 : index
    %c0_71 = arith.constant 0 : index
    %87 = vector.load %arg4[%c9_69, %c0_70, %c0_71] : memref<12x1x128xf32, #tpu.memory_space<vmem>>, vector<1x1x128xf32>
    %88 = vector.shape_cast %87 : vector<1x1x128xf32> to vector<1x128xf32>
    %89 = vector.broadcast %88 : vector<1x128xf32> to vector<8x128xf32>
    %90 = arith.addf %86, %89 : vector<8x128xf32>
    %cst_72 = arith.constant 0.000000e+00 : f32
    %91 = vector.broadcast %cst_72 : f32 to vector<8x128xf32>
    %92 = arith.maximumf %90, %91 : vector<8x128xf32>
    %c10 = arith.constant 10 : index
    %c0_73 = arith.constant 0 : index
    %c0_74 = arith.constant 0 : index
    %93 = vector.load %arg3[%c10, %c0_73, %c0_74] : memref<12x128x128xf32, #tpu.memory_space<vmem>>, vector<1x128x128xf32>
    %94 = vector.shape_cast %93 : vector<1x128x128xf32> to vector<128x128xf32>
    %cst_75 = arith.constant dense<0.000000e+00> : vector<8x128xf32>
    %95 = tpu.matmul %92, %94, %cst_75 {dimension_numbers = #tpu.dot_dimension_numbers<[1], [0], [0], [1], [0, 0, 1, 1], [], []>} : vector<8x128xf32>, vector<128x128xf32>, vector<8x128xf32> -> vector<8x128xf32>
    %c10_76 = arith.constant 10 : index
    %c0_77 = arith.constant 0 : index
    %c0_78 = arith.constant 0 : index
    %96 = vector.load %arg4[%c10_76, %c0_77, %c0_78] : memref<12x1x128xf32, #tpu.memory_space<vmem>>, vector<1x1x128xf32>
    %97 = vector.shape_cast %96 : vector<1x1x128xf32> to vector<1x128xf32>
    %98 = vector.broadcast %97 : vector<1x128xf32> to vector<8x128xf32>
    %99 = arith.addf %95, %98 : vector<8x128xf32>
    %cst_79 = arith.constant 0.000000e+00 : f32
    %100 = vector.broadcast %cst_79 : f32 to vector<8x128xf32>
    %101 = arith.maximumf %99, %100 : vector<8x128xf32>
    %c11 = arith.constant 11 : index
    %c0_80 = arith.constant 0 : index
    %c0_81 = arith.constant 0 : index
    %102 = vector.load %arg3[%c11, %c0_80, %c0_81] : memref<12x128x128xf32, #tpu.memory_space<vmem>>, vector<1x128x128xf32>
    %103 = vector.shape_cast %102 : vector<1x128x128xf32> to vector<128x128xf32>
    %cst_82 = arith.constant dense<0.000000e+00> : vector<8x128xf32>
    %104 = tpu.matmul %101, %103, %cst_82 {dimension_numbers = #tpu.dot_dimension_numbers<[1], [0], [0], [1], [0, 0, 1, 1], [], []>} : vector<8x128xf32>, vector<128x128xf32>, vector<8x128xf32> -> vector<8x128xf32>
    %c11_83 = arith.constant 11 : index
    %c0_84 = arith.constant 0 : index
    %c0_85 = arith.constant 0 : index
    %105 = vector.load %arg4[%c11_83, %c0_84, %c0_85] : memref<12x1x128xf32, #tpu.memory_space<vmem>>, vector<1x1x128xf32>
    %106 = vector.shape_cast %105 : vector<1x1x128xf32> to vector<1x128xf32>
    %107 = vector.broadcast %106 : vector<1x128xf32> to vector<8x128xf32>
    %108 = arith.addf %104, %107 : vector<8x128xf32>
    %cst_86 = arith.constant 0.000000e+00 : f32
    %109 = vector.broadcast %cst_86 : f32 to vector<8x128xf32>
    %110 = arith.maximumf %108, %109 : vector<8x128xf32>
    %c0_87 = arith.constant 0 : index
    %c0_88 = arith.constant 0 : index
    %111 = vector.load %arg5[%c0_87, %c0_88] : memref<8x128xf32, #tpu.memory_space<vmem>>, vector<8x128xf32>
    tpu.vector_store %arg5[%c0_87, %c0_88], %110 {strides = array<i32>} : memref<8x128xf32, #tpu.memory_space<vmem>>, vector<8x128xf32>,
    return
  }
  func.func @transform_0(%arg0: i32) -> (i32, i32) {
    %c0_i32 = arith.constant 0 : i32
    %c0_i32_0 = arith.constant 0 : i32
    return %arg0, %c0_i32 : i32, i32
  }
  func.func @transform_1(%arg0: i32) -> (i32, i32) {
    %c0_i32 = arith.constant 0 : i32
    %c0_i32_0 = arith.constant 0 : i32
    return %arg0, %c0_i32 : i32, i32
  }
  func.func @transform_2(%arg0: i32) -> (i32, i32, i32) {
    %c0_i32 = arith.constant 0 : i32
    %c0_i32_0 = arith.constant 0 : i32
    %c0_i32_1 = arith.constant 0 : i32
    %c0_i32_2 = arith.constant 0 : i32
    return %c0_i32, %c0_i32_0, %c0_i32_1 : i32, i32, i32
  }
  func.func @transform_3(%arg0: i32) -> (i32, i32, i32) {
    %c0_i32 = arith.constant 0 : i32
    %c0_i32_0 = arith.constant 0 : i32
    %c0_i32_1 = arith.constant 0 : i32
    %c0_i32_2 = arith.constant 0 : i32
    return %c0_i32, %c0_i32_0, %c0_i32_1 : i32, i32, i32
  }
  func.func @transform_4(%arg0: i32) -> (i32, i32) {
    %c0_i32 = arith.constant 0 : i32
    %c0_i32_0 = arith.constant 0 : i32
    return %arg0, %c0_i32 : i32, i32
  }
}

</mosaic_0001>

<bundles_post_ra>
// kernel: ae_forward.1
= control target key start
LH: loop header
LB: loop body
LE: loop exit
PB: predicated region body
PF: predicated region fallthrough
CT: control target
= control target key end

     0   :  { %9 = vsyncpa [#allocation3], 0  ;;  %s1864_s15 = smov [#allocation2]   ;;  %s2158_s0 = inlined_call_operand.vmem [shape: f32[8,128], index: 0, kind: input, shape index: {}]   ;;  %s2159_s1 = inlined_call_operand.vmem [shape: f32[8,128], index: 1, kind: input, shape index: {}]   ;;  %s2160_s2 = inlined_call_operand.hbm [shape: f32[12,128,128], index: 2, kind: input, shape index: {}]   ;;  %s2161_s3 = inlined_call_operand.vmem [shape: f32[12,1,128], index: 3, kind: input, shape index: {}]   ;;  %s2162_s4 = inlined_call_operand.vmem [shape: f32[8,128], index: 4, kind: output, shape index: {}]  }
   0x1   :  { %s19_s16 = sshll.u32 %s1864_s15, 4  ;;  %s20_s16 = int_to_ptr.vmem [resolvable:$true] %s19_s16 }
   0x2   :  { %s1850_s17 = scalar_lea.vmem %s20_s16, 24576  ;;  %p1855_p1 = scmp.lt.s32.totalorder %s20_s16, %s20_s16 }
   0x3   :  { %p1851_p0 = scmp.ne.s32.totalorder %s20_s16, %s1850_s17  ;;  %p1856_p2 = scmp.lt.s32.totalorder %s1850_s17, %s1850_s17 }
   0x5   :  { %p1857_p3 = por %p1856_p2, %p1855_p1 }
   0x7   :  { %p1858_p4 = pnand %p1857_p3, %p1851_p0 }
   0x9   :  { %1861 = shalt.err (!%p1858_p4)
}
   0xa   :  { %s1865_s18 = smov 128   ;;  %s1866_s19 = smov 8  }
   0xb   :  { %25 = dma.hbm_to_vmem [thread:$0]  %s2160_s2, 24576, %s20_s16, [#allocation3], %s1865_s18, %s1865_s18, %s1866_s19  }
   0xc   :  { %1862 = dma.done.wait [#allocation3], 24576  }
   0xd   :  { %1863 = vsyncadd [#allocation3], 4294942720  ;;  %v1867_v0 = vmov 0.0   ;;  %vm1868_vm0 = vmmov 0   ;;  %v47_v1 = vld [vmem:[#allocation2 + $0x78] sm:$0xff]  ;;  %v46_v2 = vld [vmem:[#allocation2 + $0x70] sm:$0xff] }
   0xe   :  { %1417 = vmatprep.subr.mxu0 %v1867_v0  ;;  %1449 = vmatprep.mubr.msk.f32.mxu0 %vm1868_vm0, %v1867_v0  ;;  %v45_v3 = vld [vmem:[#allocation2 + $0x68] sm:$0xff]  ;;  %v44_v4 = vld [vmem:[#allocation2 + $0x60] sm:$0xff]  ;;  %v142_v5 = vld [vmem:[#allocation2 + $0xf8] sm:$0xff] }
   0xf   :  { %1452 = vmatprep.subr.mxu1 %v1867_v0  ;;  %1484 = vmatprep.mubr.msk.f32.mxu1 %vm1868_vm0, %v1867_v0  ;;  %v43_v6 = vld [vmem:[#allocation2 + $0x58] sm:$0xff]  ;;  %v141_v7 = vld [vmem:[#allocation2 + $0xf0] sm:$0xff]  ;;  %v140_v8 = vld [vmem:[#allocation2 + $0xe8] sm:$0xff] }
  0x10   :  { %1418 = vmatpush3.msra.mxu0 %v47_v1  ;;  %1453 = vmatpush3.msra.mxu1 %v142_v5  ;;  %v42_v9 = vld [vmem:[#allocation2 + $0x50] sm:$0xff]  ;;  %v139_v10 = vld [vmem:[#allocation2 + $0xe0] sm:$0xff]  ;;  %v41_v11 = vld [vmem:[#allocation2 + $0x48] sm:$0xff] }
  0x11   :  { %1419 = vmatprep.subr.mxu0 %v1867_v0  ;;  %1454 = vmatprep.subr.mxu1 %v1867_v0  ;;  %v138_v12 = vld [vmem:[#allocation2 + $0xd8] sm:$0xff]  ;;  %v40_v13 = vld [vmem:[#allocation2 + $0x40] sm:$0xff]  ;;  %v137_v14 = vld [vmem:[#allocation2 + $0xd0] sm:$0xff] }
  0x12   :  { %1420 = vmatpush3.msra.mxu0 %v46_v2  ;;  %1455 = vmatpush3.msra.mxu1 %v141_v7  ;;  %v39_v15 = vld [vmem:[#allocation2 + $0x38] sm:$0xff]  ;;  %v136_v16 = vld [vmem:[#allocation2 + $0xc8] sm:$0xff]  ;;  %v38_v17 = vld [vmem:[#allocation2 + $0x30] sm:$0xff] }
  0x13   :  { %1421 = vmatprep.subr.mxu0 %v1867_v0  ;;  %1456 = vmatprep.subr.mxu1 %v1867_v0  ;;  %v135_v18 = vld [vmem:[#allocation2 + $0xc0] sm:$0xff]  ;;  %v37_v19 = vld [vmem:[#allocation2 + $0x28] sm:$0xff]  ;;  %v134_v20 = vld [vmem:[#allocation2 + $0xb8] sm:$0xff] }
  0x14   :  { %1422 = vmatpush3.msra.mxu0 %v45_v3  ;;  %1457 = vmatpush3.msra.mxu1 %v140_v8  ;;  %v36_v21 = vld [vmem:[#allocation2 + $0x20] sm:$0xff]  ;;  %v133_v22 = vld [vmem:[#allocation2 + $0xb0] sm:$0xff]  ;;  %v35_v23 = vld [vmem:[#allocation2 + $0x18] sm:$0xff] }
  0x15   :  { %1423 = vmatprep.subr.mxu0 %v1867_v0  ;;  %1458 = vmatprep.subr.mxu1 %v1867_v0  ;;  %v132_v24 = vld [vmem:[#allocation2 + $0xa8] sm:$0xff]  ;;  %v34_v25 = vld [vmem:[#allocation2 + $0x10] sm:$0xff]  ;;  %v131_v26 = vld [vmem:[#allocation2 + $0xa0] sm:$0xff] }
  0x16   :  { %1424 = vmatpush3.msra.mxu0 %v44_v4  ;;  %1459 = vmatpush3.msra.mxu1 %v139_v10  ;;  %v33_v27 = vld [vmem:[#allocation2 + $0x8] sm:$0xff]  ;;  %v130_v28 = vld [vmem:[#allocation2 + $0x98] sm:$0xff]  ;;  %v32_v29 = vld [vmem:[#allocation2] sm:$0xff] }
  0x17   :  { %1425 = vmatprep.subr.mxu0 %v1867_v0  ;;  %1460 = vmatprep.subr.mxu1 %v1867_v0  ;;  %v31_v30 = vld [vmem:[%s2158_s0] sm:$0xff]  ;;  %v129_v31 = vld [vmem:[#allocation2 + $0x90] sm:$0xff]  ;;  %v128_v32 = vld [vmem:[#allocation2 + $0x88] sm:$0xff] }
  0x18   :  { %1426 = vmatpush3.msra.mxu0 %v43_v6  ;;  %1461 = vmatpush3.msra.mxu1 %v138_v12  ;;  %v127_v33 = vld [vmem:[#allocation2 + $0x80] sm:$0xff]  ;;  %v238_v34 = vld [vmem:[#allocation2 + $0x178] sm:$0xff]  ;;  %v237_v35 = vld [vmem:[#allocation2 + $0x170] sm:$0xff] }
  0x19   :  { %1427 = vmatprep.subr.mxu0 %v1867_v0  ;;  %1462 = vmatprep.subr.mxu1 %v1867_v0  ;;  %v236_v36 = vld [vmem:[#allocation2 + $0x168] sm:$0xff]  ;;  %v235_v37 = vld [vmem:[#allocation2 + $0x160] sm:$0xff]  ;;  %v234_v38 = vld [vmem:[#allocation2 + $0x158] sm:$0xff] }
  0x1a   :  { %1428 = vmatpush3.msra.mxu0 %v42_v9  ;;  %1463 = vmatpush3.msra.mxu1 %v137_v14  ;;  %v233_v39 = vld [vmem:[#allocation2 + $0x150] sm:$0xff]  ;;  %v232_v40 = vld [vmem:[#allocation2 + $0x148] sm:$0xff]  ;;  %v231_v41 = vld [vmem:[#allocation2 + $0x140] sm:$0xff] }
  0x1b   :  { %1429 = vmatprep.subr.mxu0 %v1867_v0  ;;  %1464 = vmatprep.subr.mxu1 %v1867_v0  ;;  %v230_v42 = vld [vmem:[#allocation2 + $0x138] sm:$0xff]  ;;  %v229_v43 = vld [vmem:[#allocation2 + $0x130] sm:$0xff]  ;;  %v228_v44 = vld [vmem:[#allocation2 + $0x128] sm:$0xff] }
  0x1c   :  { %1430 = vmatpush3.msra.mxu0 %v41_v11  ;;  %1465 = vmatpush3.msra.mxu1 %v136_v16  ;;  %v227_v45 = vld [vmem:[#allocation2 + $0x120] sm:$0xff]  ;;  %v226_v46 = vld [vmem:[#allocation2 + $0x118] sm:$0xff]  ;;  %v225_v52 = vld [vmem:[#allocation2 + $0x110] sm:$0xff] }
  0x1d   :  { %1431 = vmatprep.subr.mxu0 %v1867_v0  ;;  %1466 = vmatprep.subr.mxu1 %v1867_v0  ;;  %v1190_v47 = vld [vmem:[%s2161_s3] ss:$0 sm:$0xff]  ;;  %v224_v53 = vld [vmem:[#allocation2 + $0x108] sm:$0xff]  ;;  %v334_v55 = vld [vmem:[#allocation2 + $0x1f8] sm:$0xff] }
  0x1e   :  { %1432 = vmatpush3.msra.mxu0 %v40_v13  ;;  %1467 = vmatpush3.msra.mxu1 %v135_v18  ;;  %v223_v54 = vld [vmem:[#allocation2 + $0x100] sm:$0xff]  ;;  %v333_v56 = vld [vmem:[#allocation2 + $0x1f0] sm:$0xff]  ;;  %v332_v57 = vld [vmem:[#allocation2 + $0x1e8] sm:$0xff] }
  0x1f   :  { %1433 = vmatprep.subr.mxu0 %v1867_v0  ;;  %1468 = vmatprep.subr.mxu1 %v1867_v0  ;;  %v331_v58 = vld [vmem:[#allocation2 + $0x1e0] sm:$0xff]  ;;  %v330_v59 = vld [vmem:[#allocation2 + $0x1d8] sm:$0xff]  ;;  %v329_v60 = vld [vmem:[#allocation2 + $0x1d0] sm:$0xff] }
  0x20   :  { %1434 = vmatpush3.msra.mxu0 %v39_v15  ;;  %1469 = vmatpush3.msra.mxu1 %v134_v20  ;;  %v328_v61 = vld [vmem:[#allocation2 + $0x1c8] sm:$0xff]  ;;  %v327_v62 = vld [vmem:[#allocation2 + $0x1c0] sm:$0xff]  ;;  %v326_v63 = vld [vmem:[#allocation2 + $0x1b8] sm:$0xff] }
  0x21   :  { %1435 = vmatprep.subr.mxu0 %v1867_v0  ;;  %1470 = vmatprep.subr.mxu1 %v1867_v0  ;;  %v325_v1 = vld [vmem:[#allocation2 + $0x1b0] sm:$0xff]  ;;  %v324_v2 = vld [vmem:[#allocation2 + $0x1a8] sm:$0xff]  ;;  %v323_v3 = vld [vmem:[#allocation2 + $0x1a0] sm:$0xff] }
  0x22   :  { %1436 = vmatpush3.msra.mxu0 %v38_v17  ;;  %1471 = vmatpush3.msra.mxu1 %v133_v22  ;;  %v322_v4 = vld [vmem:[#allocation2 + $0x198] sm:$0xff]  ;;  %v1192_v5 = vld [vmem:[%s2161_s3 + $0x1] ss:$0 sm:$0xff]  ;;  %v321_v10 = vld [vmem:[#allocation2 + $0x190] sm:$0xff] }
  0x23   :  { %1437 = vmatprep.subr.mxu0 %v1867_v0  ;;  %1472 = vmatprep.subr.mxu1 %v1867_v0  ;;  %v320_v11 = vld [vmem:[#allocation2 + $0x188] sm:$0xff]  ;;  %v319_v12 = vld [vmem:[#allocation2 + $0x180] sm:$0xff]  ;;  %v432_v13 = vld [vmem:[#allocation2 + $0x278] sm:$0xff] }
  0x24   :  { %1438 = vmatpush3.msra.mxu0 %v37_v19  ;;  %1473 = vmatpush3.msra.mxu1 %v132_v24  ;;  %v431_v14 = vld [vmem:[#allocation2 + $0x270] sm:$0xff]  ;;  %v430_v15 = vld [vmem:[#allocation2 + $0x268] sm:$0xff]  ;;  %v429_v16 = vld [vmem:[#allocation2 + $0x260] sm:$0xff] }
  0x25   :  { %1439 = vmatprep.subr.mxu0 %v1867_v0  ;;  %1474 = vmatprep.subr.mxu1 %v1867_v0  ;;  %v428_v17 = vld [vmem:[#allocation2 + $0x258] sm:$0xff]  ;;  %v427_v18 = vld [vmem:[#allocation2 + $0x250] sm:$0xff]  ;;  %v426_v19 = vld [vmem:[#allocation2 + $0x248] sm:$0xff] }
  0x26   :  { %1440 = vmatpush3.msra.mxu0 %v36_v21  ;;  %1475 = vmatpush3.msra.mxu1 %v131_v26  ;;  %v425_v20 = vld [vmem:[#allocation2 + $0x240] sm:$0xff]  ;;  %v424_v21 = vld [vmem:[#allocation2 + $0x238] sm:$0xff]  ;;  %v423_v22 = vld [vmem:[#allocation2 + $0x230] sm:$0xff] }
  0x27   :  { %1441 = vmatprep.subr.mxu0 %v1867_v0  ;;  %1476 = vmatprep.subr.mxu1 %v1867_v0  ;;  %v421_v24 = vld [vmem:[#allocation2 + $0x220] sm:$0xff] }
  0x28   :  { %1442 = vmatpush3.msra.mxu0 %v35_v23  ;;  %1477 = vmatpush3.msra.mxu1 %v130_v28  ;;  %v422_v23 = vld [vmem:[#allocation2 + $0x228] sm:$0xff] }
  0x29   :  { %1443 = vmatprep.subr.mxu0 %v1867_v0  ;;  %1478 = vmatprep.subr.mxu1 %v1867_v0 }
  0x2a   :  { %1444 = vmatpush3.msra.mxu0 %v34_v25  ;;  %1479 = vmatpush3.msra.mxu1 %v129_v31  ;;  %v1194_v25 = vld [vmem:[%s2161_s3 + $0x2] ss:$0 sm:$0xff]  ;;  %v419_v31 = vld [vmem:[#allocation2 + $0x210] sm:$0xff] }
  0x2b   :  { %1445 = vmatprep.subr.mxu0 %v1867_v0  ;;  %1480 = vmatprep.subr.mxu1 %v1867_v0 }
  0x2c   :  { %1446 = vmatpush3.msra.mxu0 %v33_v27  ;;  %1481 = vmatpush3.msra.mxu1 %v128_v32  ;;  %v418_v32 = vld [vmem:[#allocation2 + $0x208] sm:$0xff] }
  0x2d   :  { %1447 = vmatprep.subr.mxu0 %v1867_v0  ;;  %1482 = vmatprep.subr.mxu1 %v1867_v0 }
  0x2e   :  { %1448 = vmatpush3.msra.mxu0 %v32_v29  ;;  %1483 = vmatpush3.msra.mxu1 %v127_v33  ;;  %v417_v33 = vld [vmem:[#allocation2 + $0x200] sm:$0xff] }
  0x2f   :  { %1450 = vmatmul.mubr.f32.vlgmr.msra.gmra.mxu0 %v31_v30  ;;  %1487 = vmatprep.subr.mxu0 %v1867_v0  ;;  %v420_v30 = vld [vmem:[#allocation2 + $0x218] sm:$0xff] }
  0x30   :  { %1519 = vmatprep.mubr.msk.f32.mxu0 %vm1868_vm0, %v1867_v0  ;;  %1522 = vmatprep.subr.mxu1 %v1867_v0 }
  0x31   :  { %1488 = vmatpush3.msra.mxu0 %v238_v34  ;;  %v528_v34 = vld [vmem:[#allocation2 + $0x2f8] sm:$0xff] }
  0x32   :  { %1489 = vmatprep.subr.mxu0 %v1867_v0 }
  0x33   :  { %1490 = vmatpush3.msra.mxu0 %v237_v35  ;;  %v527_v35 = vld [vmem:[#allocation2 + $0x2f0] sm:$0xff] }
  0x34   :  { %1491 = vmatprep.subr.mxu0 %v1867_v0 }
  0x35   :  { %1492 = vmatpush3.msra.mxu0 %v236_v36  ;;  %v526_v36 = vld [vmem:[#allocation2 + $0x2e8] sm:$0xff] }
  0x36   :  { %1493 = vmatprep.subr.mxu0 %v1867_v0 }
  0x37   :  { %1494 = vmatpush3.msra.mxu0 %v235_v37  ;;  %v525_v37 = vld [vmem:[#allocation2 + $0x2e0] sm:$0xff] }
  0x38   :  { %1495 = vmatprep.subr.mxu0 %v1867_v0 }
  0x39   :  { %1496 = vmatpush3.msra.mxu0 %v234_v38  ;;  %v524_v38 = vld [vmem:[#allocation2 + $0x2d8] sm:$0xff] }
  0x3a   :  { %1497 = vmatprep.subr.mxu0 %v1867_v0 }
  0x3b   :  { %1498 = vmatpush3.msra.mxu0 %v233_v39  ;;  %v523_v39 = vld [vmem:[#allocation2 + $0x2d0] sm:$0xff] }
  0x3c   :  { %1499 = vmatprep.subr.mxu0 %v1867_v0 }
  0x3d   :  { %1500 = vmatpush3.msra.mxu0 %v232_v40  ;;  %v522_v40 = vld [vmem:[#allocation2 + $0x2c8] sm:$0xff] }
  0x3e   :  { %1501 = vmatprep.subr.mxu0 %v1867_v0 }
  0x3f   :  { %1502 = vmatpush3.msra.mxu0 %v231_v41  ;;  %v521_v41 = vld [vmem:[#allocation2 + $0x2c0] sm:$0xff] }
  0x40   :  { %1503 = vmatprep.subr.mxu0 %v1867_v0 }
  0x41   :  { %1504 = vmatpush3.msra.mxu0 %v230_v42  ;;  %v520_v42 = vld [vmem:[#allocation2 + $0x2b8] sm:$0xff] }
  0x42   :  { %1505 = vmatprep.subr.mxu0 %v1867_v0 }
  0x43   :  { %1506 = vmatpush3.msra.mxu0 %v229_v43  ;;  %v519_v43 = vld [vmem:[#allocation2 + $0x2b0] sm:$0xff] }
  0x44   :  { %1507 = vmatprep.subr.mxu0 %v1867_v0 }
  0x45   :  { %1508 = vmatpush3.msra.mxu0 %v228_v44  ;;  %v518_v44 = vld [vmem:[#allocation2 + $0x2a8] sm:$0xff] }
  0x46   :  { %1509 = vmatprep.subr.mxu0 %v1867_v0 }
  0x47   :  { %1510 = vmatpush3.msra.mxu0 %v227_v45  ;;  %v517_v45 = vld [vmem:[#allocation2 + $0x2a0] sm:$0xff] }
  0x48   :  { %1511 = vmatprep.subr.mxu0 %v1867_v0 }
  0x49   :  { %1512 = vmatpush3.msra.mxu0 %v226_v46  ;;  %v516_v46 = vld [vmem:[#allocation2 + $0x298] sm:$0xff] }
  0x4a   :  { %1513 = vmatprep.subr.mxu0 %v1867_v0 }
  0x4b   :  { %1514 = vmatpush3.msra.mxu0 %v225_v52 }
  0x4c   :  { %1515 = vmatprep.subr.mxu0 %v1867_v0 }
  0x4d   :  { %1516 = vmatpush3.msra.mxu0 %v224_v53 }
  0x4e   :  { %1517 = vmatprep.subr.mxu0 %v1867_v0 }
  0x4f   :  { %1518 = vmatpush3.msra.mxu0 %v223_v54  ;;  %v515_v54 = vld [vmem:[#allocation2 + $0x290] sm:$0xff] }
  0x50   :  { %1557 = vmatprep.subr.mxu0 %v1867_v0 }
  0xef   :  { %v121_v48 = vpop.f32.mrf.mxu0 }
  0xf0   :  { %v122_v49 = vadd.f32 %v1190_v47, %v121_v48  ;;  %v1196_v47 = vld [vmem:[%s2161_s3 + $0x3] ss:$0 sm:$0xff] }
  0xf1   :  { %v1451_v50 = vpop.f32.mrf.mxu0 }
  0xf2   :  { %v125_v51 = vmax.f32 %v122_v49, 0.0  ;;  %v414_v50 = vld [vmem:[%s2159_s1] sm:$0xff] }
  0xf4   :  { %1485 = vmatmul.mubr.f32.vlgmr.msra.gmra.mxu1 %v125_v51 }
  0xf5   :  { %1554 = vmatprep.mubr.msk.f32.mxu1 %vm1868_vm0, %v1867_v0  ;;  %1523 = vmatpush3.msra.mxu1 %v334_v55  ;;  %v514_v55 = vld [vmem:[#allocation2 + $0x288] sm:$0xff] }
  0xf6   :  { %1524 = vmatprep.subr.mxu1 %v1867_v0 }
  0xf7   :  { %1525 = vmatpush3.msra.mxu1 %v333_v56  ;;  %v513_v56 = vld [vmem:[#allocation2 + $0x280] sm:$0xff] }
  0xf8   :  { %1526 = vmatprep.subr.mxu1 %v1867_v0 }
  0xf9   :  { %1527 = vmatpush3.msra.mxu1 %v332_v57  ;;  %v624_v57 = vld [vmem:[#allocation2 + $0x378] sm:$0xff] }
  0xfa   :  { %1528 = vmatprep.subr.mxu1 %v1867_v0 }
  0xfb   :  { %1529 = vmatpush3.msra.mxu1 %v331_v58  ;;  %v623_v58 = vld [vmem:[#allocation2 + $0x370] sm:$0xff] }
  0xfc   :  { %1530 = vmatprep.subr.mxu1 %v1867_v0 }
  0xfd   :  { %1531 = vmatpush3.msra.mxu1 %v330_v59  ;;  %v622_v59 = vld [vmem:[#allocation2 + $0x368] sm:$0xff] }
  0xfe   :  { %1532 = vmatprep.subr.mxu1 %v1867_v0 }
  0xff   :  { %1533 = vmatpush3.msra.mxu1 %v329_v60  ;;  %v621_v60 = vld [vmem:[#allocation2 + $0x360] sm:$0xff] }
 0x100   :  { %1534 = vmatprep.subr.mxu1 %v1867_v0 }
 0x101   :  { %1535 = vmatpush3.msra.mxu1 %v328_v61  ;;  %v620_v61 = vld [vmem:[#allocation2 + $0x358] sm:$0xff] }
 0x102   :  { %1536 = vmatprep.subr.mxu1 %v1867_v0 }
 0x103   :  { %1537 = vmatpush3.msra.mxu1 %v327_v62  ;;  %v619_v62 = vld [vmem:[#allocation2 + $0x350] sm:$0xff] }
 0x104   :  { %1538 = vmatprep.subr.mxu1 %v1867_v0 }
 0x105   :  { %1539 = vmatpush3.msra.mxu1 %v326_v63  ;;  %v618_v63 = vld [vmem:[#allocation2 + $0x348] sm:$0xff] }
 0x106   :  { %1540 = vmatprep.subr.mxu1 %v1867_v0 }
 0x107   :  { %1541 = vmatpush3.msra.mxu1 %v325_v1  ;;  %v617_v1 = vld [vmem:[#allocation2 + $0x340] sm:$0xff] }
 0x108   :  { %1542 = vmatprep.subr.mxu1 %v1867_v0 }
 0x109   :  { %1543 = vmatpush3.msra.mxu1 %v324_v2  ;;  %v616_v2 = vld [vmem:[#allocation2 + $0x338] sm:$0xff] }
 0x10a   :  { %1544 = vmatprep.subr.mxu1 %v1867_v0 }
 0x10b   :  { %1545 = vmatpush3.msra.mxu1 %v323_v3  ;;  %v615_v3 = vld [vmem:[#allocation2 + $0x330] sm:$0xff] }
 0x10c   :  { %1546 = vmatprep.subr.mxu1 %v1867_v0 }
 0x10d   :  { %1547 = vmatpush3.msra.mxu1 %v322_v4  ;;  %v614_v4 = vld [vmem:[#allocation2 + $0x328] sm:$0xff] }
 0x10e   :  { %1548 = vmatprep.subr.mxu1 %v1867_v0 }
 0x10f   :  { %1549 = vmatpush3.msra.mxu1 %v321_v10 }
 0x110   :  { %1550 = vmatprep.subr.mxu1 %v1867_v0 }
 0x111   :  { %1551 = vmatpush3.msra.mxu1 %v320_v11 }
 0x112   :  { %1552 = vmatprep.subr.mxu1 %v1867_v0 }
 0x113   :  { %1553 = vmatpush3.msra.mxu1 %v319_v12  ;;  %v611_v12 = vld [vmem:[#allocation2 + $0x310] sm:$0xff] }
 0x114   :  { %1592 = vmatprep.subr.mxu1 %v1867_v0 }
 0x1b4   :  { %v217_v6 = vpop.f32.mrf.mxu1 }
 0x1b5   :  { %v218_v7 = vadd.f32 %v1192_v5, %v217_v6  ;;  %v613_v5 = vld [vmem:[#allocation2 + $0x320] sm:$0xff]  ;;  %v612_v6 = vld [vmem:[#allocation2 + $0x318] sm:$0xff] }
 0x1b6   :  { %v1486_v8 = vpop.f32.mrf.mxu1 }
 0x1b7   :  { %v221_v9 = vmax.f32 %v218_v7, 0.0  ;;  %v1198_v7 = vld [vmem:[%s2161_s3 + $0x4] ss:$0 sm:$0xff] }
 0x1b9   :  { %1520 = vmatmul.mubr.f32.vlgmr.msra.gmra.mxu0 %v221_v9 }
 0x1ba   :  { %1589 = vmatprep.mubr.msk.f32.mxu0 %vm1868_vm0, %v1867_v0  ;;  %1558 = vmatpush3.msra.mxu0 %v432_v13  ;;  %v610_v13 = vld [vmem:[#allocation2 + $0x308] sm:$0xff] }
 0x1bb   :  { %1559 = vmatprep.subr.mxu0 %v1867_v0 }
 0x1bc   :  { %1560 = vmatpush3.msra.mxu0 %v431_v14  ;;  %v609_v14 = vld [vmem:[#allocation2 + $0x300] sm:$0xff] }
 0x1bd   :  { %1561 = vmatprep.subr.mxu0 %v1867_v0 }
 0x1be   :  { %1562 = vmatpush3.msra.mxu0 %v430_v15  ;;  %v720_v15 = vld [vmem:[#allocation2 + $0x3f8] sm:$0xff] }
 0x1bf   :  { %1563 = vmatprep.subr.mxu0 %v1867_v0 }
 0x1c0   :  { %1564 = vmatpush3.msra.mxu0 %v429_v16  ;;  %v719_v16 = vld [vmem:[#allocation2 + $0x3f0] sm:$0xff] }
 0x1c1   :  { %1565 = vmatprep.subr.mxu0 %v1867_v0 }
 0x1c2   :  { %1566 = vmatpush3.msra.mxu0 %v428_v17  ;;  %v718_v17 = vld [vmem:[#allocation2 + $0x3e8] sm:$0xff] }
 0x1c3   :  { %1567 = vmatprep.subr.mxu0 %v1867_v0 }
 0x1c4   :  { %1568 = vmatpush3.msra.mxu0 %v427_v18  ;;  %v717_v18 = vld [vmem:[#allocation2 + $0x3e0] sm:$0xff] }
 0x1c5   :  { %1569 = vmatprep.subr.mxu0 %v1867_v0 }
 0x1c6   :  { %1570 = vmatpush3.msra.mxu0 %v426_v19  ;;  %v716_v19 = vld [vmem:[#allocation2 + $0x3d8] sm:$0xff] }
 0x1c7   :  { %1571 = vmatprep.subr.mxu0 %v1867_v0 }
 0x1c8   :  { %1572 = vmatpush3.msra.mxu0 %v425_v20  ;;  %v715_v20 = vld [vmem:[#allocation2 + $0x3d0] sm:$0xff] }
 0x1c9   :  { %1573 = vmatprep.subr.mxu0 %v1867_v0 }
 0x1ca   :  { %1574 = vmatpush3.msra.mxu0 %v424_v21  ;;  %v714_v21 = vld [vmem:[#allocation2 + $0x3c8] sm:$0xff] }
 0x1cb   :  { %1575 = vmatprep.subr.mxu0 %v1867_v0 }
 0x1cc   :  { %1576 = vmatpush3.msra.mxu0 %v423_v22  ;;  %v713_v22 = vld [vmem:[#allocation2 + $0x3c0] sm:$0xff] }
 0x1cd   :  { %1577 = vmatprep.subr.mxu0 %v1867_v0 }
 0x1ce   :  { %1578 = vmatpush3.msra.mxu0 %v422_v23  ;;  %v712_v23 = vld [vmem:[#allocation2 + $0x3b8] sm:$0xff] }
 0x1cf   :  { %1579 = vmatprep.subr.mxu0 %v1867_v0 }
 0x1d0   :  { %1580 = vmatpush3.msra.mxu0 %v421_v24  ;;  %v711_v24 = vld [vmem:[#allocation2 + $0x3b0] sm:$0xff] }
 0x1d1   :  { %1581 = vmatprep.subr.mxu0 %v1867_v0 }
 0x1d2   :  { %1582 = vmatpush3.msra.mxu0 %v420_v30 }
 0x1d3   :  { %1583 = vmatprep.subr.mxu0 %v1867_v0 }
 0x1d4   :  { %1584 = vmatpush3.msra.mxu0 %v419_v31 }
 0x1d5   :  { %1585 = vmatprep.subr.mxu0 %v1867_v0 }
 0x1d6   :  { %1586 = vmatpush3.msra.mxu0 %v418_v32 }
 0x1d7   :  { %1587 = vmatprep.subr.mxu0 %v1867_v0 }
 0x1d8   :  { %1588 = vmatpush3.msra.mxu0 %v417_v33  ;;  %v707_v33 = vld [vmem:[#allocation2 + $0x390] sm:$0xff] }
 0x1d9   :  { %1627 = vmatprep.subr.mxu0 %v1867_v0 }
 0x279   :  { %v313_v26 = vpop.f32.mrf.mxu0 }
 0x27a   :  { %v314_v27 = vadd.f32 %v1194_v25, %v313_v26  ;;  %v710_v25 = vld [vmem:[#allocation2 + $0x3a8] sm:$0xff]  ;;  %v709_v26 = vld [vmem:[#allocation2 + $0x3a0] sm:$0xff] }
 0x27b   :  { %v1521_v28 = vpop.f32.mrf.mxu0 }
 0x27c   :  { %v317_v29 = vmax.f32 %v314_v27, 0.0  ;;  %v708_v27 = vld [vmem:[#allocation2 + $0x398] sm:$0xff]  ;;  %v1200_v28 = vld [vmem:[%s2161_s3 + $0x5] ss:$0 sm:$0xff] }
 0x27e   :  { %1555 = vmatmul.mubr.f32.vlgmr.msra.gmra.mxu1 %v317_v29 }
 0x27f   :  { %1624 = vmatprep.mubr.msk.f32.mxu1 %vm1868_vm0, %v1867_v0  ;;  %1593 = vmatpush3.msra.mxu1 %v528_v34  ;;  %v706_v34 = vld [vmem:[#allocation2 + $0x388] sm:$0xff] }
 0x280   :  { %1594 = vmatprep.subr.mxu1 %v1867_v0 }
 0x281   :  { %1595 = vmatpush3.msra.mxu1 %v527_v35  ;;  %v705_v35 = vld [vmem:[#allocation2 + $0x380] sm:$0xff] }
 0x282   :  { %1596 = vmatprep.subr.mxu1 %v1867_v0 }
 0x283   :  { %1597 = vmatpush3.msra.mxu1 %v526_v36  ;;  %v816_v36 = vld [vmem:[#allocation2 + $0x478] sm:$0xff] }
 0x284   :  { %1598 = vmatprep.subr.mxu1 %v1867_v0 }
 0x285   :  { %1599 = vmatpush3.msra.mxu1 %v525_v37  ;;  %v815_v37 = vld [vmem:[#allocation2 + $0x470] sm:$0xff] }
 0x286   :  { %1600 = vmatprep.subr.mxu1 %v1867_v0 }
 0x287   :  { %1601 = vmatpush3.msra.mxu1 %v524_v38  ;;  %v814_v38 = vld [vmem:[#allocation2 + $0x468] sm:$0xff] }
 0x288   :  { %1602 = vmatprep.subr.mxu1 %v1867_v0 }
 0x289   :  { %1603 = vmatpush3.msra.mxu1 %v523_v39  ;;  %v813_v39 = vld [vmem:[#allocation2 + $0x460] sm:$0xff] }
 0x28a   :  { %1604 = vmatprep.subr.mxu1 %v1867_v0 }
 0x28b   :  { %1605 = vmatpush3.msra.mxu1 %v522_v40  ;;  %v812_v40 = vld [vmem:[#allocation2 + $0x458] sm:$0xff] }
 0x28c   :  { %1606 = vmatprep.subr.mxu1 %v1867_v0 }
 0x28d   :  { %1607 = vmatpush3.msra.mxu1 %v521_v41  ;;  %v811_v41 = vld [vmem:[#allocation2 + $0x450] sm:$0xff] }
 0x28e   :  { %1608 = vmatprep.subr.mxu1 %v1867_v0 }
 0x28f   :  { %1609 = vmatpush3.msra.mxu1 %v520_v42  ;;  %v810_v42 = vld [vmem:[#allocation2 + $0x448] sm:$0xff] }
 0x290   :  { %1610 = vmatprep.subr.mxu1 %v1867_v0 }
 0x291   :  { %1611 = vmatpush3.msra.mxu1 %v519_v43  ;;  %v809_v43 = vld [vmem:[#allocation2 + $0x440] sm:$0xff] }
 0x292   :  { %1612 = vmatprep.subr.mxu1 %v1867_v0 }
 0x293   :  { %1613 = vmatpush3.msra.mxu1 %v518_v44  ;;  %v808_v44 = vld [vmem:[#allocation2 + $0x438] sm:$0xff] }
 0x294   :  { %1614 = vmatprep.subr.mxu1 %v1867_v0 }
 0x295   :  { %1615 = vmatpush3.msra.mxu1 %v517_v45  ;;  %v807_v45 = vld [vmem:[#allocation2 + $0x430] sm:$0xff] }
 0x296   :  { %1616 = vmatprep.subr.mxu1 %v1867_v0 }
 0x297   :  { %1617 = vmatpush3.msra.mxu1 %v516_v46  ;;  %v806_v46 = vld [vmem:[#allocation2 + $0x428] sm:$0xff] }
 0x298   :  { %1618 = vmatprep.subr.mxu1 %v1867_v0 }
 0x299   :  { %1619 = vmatpush3.msra.mxu1 %v515_v54  ;;  %v803_v54 = vld [vmem:[#allocation2 + $0x410] sm:$0xff] }
 0x29a   :  { %1620 = vmatprep.subr.mxu1 %v1867_v0 }
 0x29b   :  { %1621 = vmatpush3.msra.mxu1 %v514_v55  ;;  %v802_v55 = vld [vmem:[#allocation2 + $0x408] sm:$0xff] }
 0x29c   :  { %1622 = vmatprep.subr.mxu1 %v1867_v0 }
 0x29d   :  { %1623 = vmatpush3.msra.mxu1 %v513_v56  ;;  %v801_v56 = vld [vmem:[#allocation2 + $0x400] sm:$0xff] }
 0x29e   :  { %1662 = vmatprep.subr.mxu1 %v1867_v0 }
 0x33e   :  { %v409_v48 = vpop.f32.mrf.mxu1 }
 0x33f   :  { %v410_v49 = vadd.f32 %v1196_v47, %v409_v48  ;;  %v805_v47 = vld [vmem:[#allocation2 + $0x420] sm:$0xff]  ;;  %v804_v48 = vld [vmem:[#allocation2 + $0x418] sm:$0xff] }
 0x340   :  { %v1556_v51 = vpop.f32.mrf.mxu1 }
 0x341   :  { %v413_v52 = vmax.f32 %v410_v49, 0.0  ;;  %v1202_v49 = vld [vmem:[%s2161_s3 + $0x6] ss:$0 sm:$0xff] }
 0x343   :  { %v415_v53 = vadd.f32 %v414_v50, %v413_v52 }
 0x345   :  { %1590 = vmatmul.mubr.f32.vlgmr.msra.gmra.mxu0 %v415_v53 }
 0x346   :  { %1659 = vmatprep.mubr.msk.f32.mxu0 %vm1868_vm0, %v1867_v0  ;;  %1628 = vmatpush3.msra.mxu0 %v624_v57  ;;  %v912_v57 = vld [vmem:[#allocation2 + $0x4f8] sm:$0xff] }
 0x347   :  { %1629 = vmatprep.subr.mxu0 %v1867_v0 }
 0x348   :  { %1630 = vmatpush3.msra.mxu0 %v623_v58  ;;  %v911_v58 = vld [vmem:[#allocation2 + $0x4f0] sm:$0xff] }
 0x349   :  { %1631 = vmatprep.subr.mxu0 %v1867_v0 }
 0x34a   :  { %1632 = vmatpush3.msra.mxu0 %v622_v59  ;;  %v910_v59 = vld [vmem:[#allocation2 + $0x4e8] sm:$0xff] }
 0x34b   :  { %1633 = vmatprep.subr.mxu0 %v1867_v0 }
 0x34c   :  { %1634 = vmatpush3.msra.mxu0 %v621_v60  ;;  %v909_v60 = vld [vmem:[#allocation2 + $0x4e0] sm:$0xff] }
 0x34d   :  { %1635 = vmatprep.subr.mxu0 %v1867_v0 }
 0x34e   :  { %1636 = vmatpush3.msra.mxu0 %v620_v61  ;;  %v908_v61 = vld [vmem:[#allocation2 + $0x4d8] sm:$0xff] }
 0x34f   :  { %1637 = vmatprep.subr.mxu0 %v1867_v0 }
 0x350   :  { %1638 = vmatpush3.msra.mxu0 %v619_v62  ;;  %v907_v62 = vld [vmem:[#allocation2 + $0x4d0] sm:$0xff] }
 0x351   :  { %1639 = vmatprep.subr.mxu0 %v1867_v0 }
 0x352   :  { %1640 = vmatpush3.msra.mxu0 %v618_v63  ;;  %v906_v63 = vld [vmem:[#allocation2 + $0x4c8] sm:$0xff] }
 0x353   :  { %1641 = vmatprep.subr.mxu0 %v1867_v0 }
 0x354   :  { %1642 = vmatpush3.msra.mxu0 %v617_v1  ;;  %v905_v1 = vld [vmem:[#allocation2 + $0x4c0] sm:$0xff] }
 0x355   :  { %1643 = vmatprep.subr.mxu0 %v1867_v0 }
 0x356   :  { %1644 = vmatpush3.msra.mxu0 %v616_v2  ;;  %v904_v2 = vld [vmem:[#allocation2 + $0x4b8] sm:$0xff] }
 0x357   :  { %1645 = vmatprep.subr.mxu0 %v1867_v0 }
 0x358   :  { %1646 = vmatpush3.msra.mxu0 %v615_v3  ;;  %v903_v3 = vld [vmem:[#allocation2 + $0x4b0] sm:$0xff] }
 0x359   :  { %1647 = vmatprep.subr.mxu0 %v1867_v0 }
 0x35a   :  { %1648 = vmatpush3.msra.mxu0 %v614_v4  ;;  %v902_v4 = vld [vmem:[#allocation2 + $0x4a8] sm:$0xff] }
 0x35b   :  { %1649 = vmatprep.subr.mxu0 %v1867_v0 }
 0x35c   :  { %1650 = vmatpush3.msra.mxu0 %v613_v5  ;;  %v901_v5 = vld [vmem:[#allocation2 + $0x4a0] sm:$0xff] }
 0x35d   :  { %1651 = vmatprep.subr.mxu0 %v1867_v0 }
 0x35e   :  { %1652 = vmatpush3.msra.mxu0 %v612_v6  ;;  %v900_v6 = vld [vmem:[#allocation2 + $0x498] sm:$0xff] }
 0x35f   :  { %1653 = vmatprep.subr.mxu0 %v1867_v0 }
 0x360   :  { %1654 = vmatpush3.msra.mxu0 %v611_v12  ;;  %v899_v12 = vld [vmem:[#allocation2 + $0x490] sm:$0xff] }
 0x361   :  { %1655 = vmatprep.subr.mxu0 %v1867_v0 }
 0x362   :  { %1656 = vmatpush3.msra.mxu0 %v610_v13  ;;  %v898_v13 = vld [vmem:[#allocation2 + $0x488] sm:$0xff] }
 0x363   :  { %1657 = vmatprep.subr.mxu0 %v1867_v0 }
 0x364   :  { %1658 = vmatpush3.msra.mxu0 %v609_v14  ;;  %v897_v14 = vld [vmem:[#allocation2 + $0x480] sm:$0xff] }
 0x365   :  { %1697 = vmatprep.subr.mxu0 %v1867_v0 }
 0x405   :  { %v507_v8 = vpop.f32.mrf.mxu0 }
 0x406   :  { %v508_v9 = vadd.f32 %v1198_v7, %v507_v8  ;;  %v1204_v7 = vld [vmem:[%s2161_s3 + $0x7] ss:$0 sm:$0xff] }
 0x407   :  { %v1591_v10 = vpop.f32.mrf.mxu0 }
 0x408   :  { %v511_v11 = vmax.f32 %v508_v9, 0.0 }
 0x40a   :  { %1625 = vmatmul.mubr.f32.vlgmr.msra.gmra.mxu1 %v511_v11 }
 0x40b   :  { %1694 = vmatprep.mubr.msk.f32.mxu1 %vm1868_vm0, %v1867_v0  ;;  %1663 = vmatpush3.msra.mxu1 %v720_v15  ;;  %v1008_v15 = vld [vmem:[#allocation2 + $0x578] sm:$0xff] }
 0x40c   :  { %1664 = vmatprep.subr.mxu1 %v1867_v0 }
 0x40d   :  { %1665 = vmatpush3.msra.mxu1 %v719_v16  ;;  %v1007_v16 = vld [vmem:[#allocation2 + $0x570] sm:$0xff] }
 0x40e   :  { %1666 = vmatprep.subr.mxu1 %v1867_v0 }
 0x40f   :  { %1667 = vmatpush3.msra.mxu1 %v718_v17  ;;  %v1006_v17 = vld [vmem:[#allocation2 + $0x568] sm:$0xff] }
 0x410   :  { %1668 = vmatprep.subr.mxu1 %v1867_v0 }
 0x411   :  { %1669 = vmatpush3.msra.mxu1 %v717_v18  ;;  %v1005_v18 = vld [vmem:[#allocation2 + $0x560] sm:$0xff] }
 0x412   :  { %1670 = vmatprep.subr.mxu1 %v1867_v0 }
 0x413   :  { %1671 = vmatpush3.msra.mxu1 %v716_v19  ;;  %v1004_v19 = vld [vmem:[#allocation2 + $0x558] sm:$0xff] }
 0x414   :  { %1672 = vmatprep.subr.mxu1 %v1867_v0 }
 0x415   :  { %1673 = vmatpush3.msra.mxu1 %v715_v20  ;;  %v1003_v20 = vld [vmem:[#allocation2 + $0x550] sm:$0xff] }
 0x416   :  { %1674 = vmatprep.subr.mxu1 %v1867_v0 }
 0x417   :  { %1675 = vmatpush3.msra.mxu1 %v714_v21  ;;  %v1002_v21 = vld [vmem:[#allocation2 + $0x548] sm:$0xff] }
 0x418   :  { %1676 = vmatprep.subr.mxu1 %v1867_v0 }
 0x419   :  { %1677 = vmatpush3.msra.mxu1 %v713_v22  ;;  %v1001_v22 = vld [vmem:[#allocation2 + $0x540] sm:$0xff] }
 0x41a   :  { %1678 = vmatprep.subr.mxu1 %v1867_v0 }
 0x41b   :  { %1679 = vmatpush3.msra.mxu1 %v712_v23  ;;  %v1000_v23 = vld [vmem:[#allocation2 + $0x538] sm:$0xff] }
 0x41c   :  { %1680 = vmatprep.subr.mxu1 %v1867_v0 }
 0x41d   :  { %1681 = vmatpush3.msra.mxu1 %v711_v24  ;;  %v999_v24 = vld [vmem:[#allocation2 + $0x530] sm:$0xff] }
 0x41e   :  { %1682 = vmatprep.subr.mxu1 %v1867_v0 }
 0x41f   :  { %1683 = vmatpush3.msra.mxu1 %v710_v25  ;;  %v998_v25 = vld [vmem:[#allocation2 + $0x528] sm:$0xff] }
 0x420   :  { %1684 = vmatprep.subr.mxu1 %v1867_v0 }
 0x421   :  { %1685 = vmatpush3.msra.mxu1 %v709_v26  ;;  %v997_v26 = vld [vmem:[#allocation2 + $0x520] sm:$0xff] }
 0x422   :  { %1686 = vmatprep.subr.mxu1 %v1867_v0 }
 0x423   :  { %1687 = vmatpush3.msra.mxu1 %v708_v27  ;;  %v996_v27 = vld [vmem:[#allocation2 + $0x518] sm:$0xff] }
 0x424   :  { %1688 = vmatprep.subr.mxu1 %v1867_v0 }
 0x425   :  { %1689 = vmatpush3.msra.mxu1 %v707_v33  ;;  %v995_v33 = vld [vmem:[#allocation2 + $0x510] sm:$0xff] }
 0x426   :  { %1690 = vmatprep.subr.mxu1 %v1867_v0 }
 0x427   :  { %1691 = vmatpush3.msra.mxu1 %v706_v34  ;;  %v994_v34 = vld [vmem:[#allocation2 + $0x508] sm:$0xff] }
 0x428   :  { %1692 = vmatprep.subr.mxu1 %v1867_v0 }
 0x429   :  { %1693 = vmatpush3.msra.mxu1 %v705_v35  ;;  %v993_v35 = vld [vmem:[#allocation2 + $0x500] sm:$0xff] }
 0x42a   :  { %1732 = vmatprep.subr.mxu1 %v1867_v0 }
 0x4ca   :  { %v603_v29 = vpop.f32.mrf.mxu1 }
 0x4cb   :  { %v604_v30 = vadd.f32 %v1200_v28, %v603_v29  ;;  %v1206_v28 = vld [vmem:[%s2161_s3 + $0x8] ss:$0 sm:$0xff] }
 0x4cc   :  { %v1626_v31 = vpop.f32.mrf.mxu1 }
 0x4cd   :  { %v607_v32 = vmax.f32 %v604_v30, 0.0 }
 0x4cf   :  { %1660 = vmatmul.mubr.f32.vlgmr.msra.gmra.mxu0 %v607_v32 }
 0x4d0   :  { %1729 = vmatprep.mubr.msk.f32.mxu0 %vm1868_vm0, %v1867_v0  ;;  %1698 = vmatpush3.msra.mxu0 %v816_v36  ;;  %v1104_v36 = vld [vmem:[#allocation2 + $0x5f8] sm:$0xff] }
 0x4d1   :  { %1699 = vmatprep.subr.mxu0 %v1867_v0 }
 0x4d2   :  { %1700 = vmatpush3.msra.mxu0 %v815_v37  ;;  %v1103_v37 = vld [vmem:[#allocation2 + $0x5f0] sm:$0xff] }
 0x4d3   :  { %1701 = vmatprep.subr.mxu0 %v1867_v0 }
 0x4d4   :  { %1702 = vmatpush3.msra.mxu0 %v814_v38  ;;  %v1102_v38 = vld [vmem:[#allocation2 + $0x5e8] sm:$0xff] }
 0x4d5   :  { %1703 = vmatprep.subr.mxu0 %v1867_v0 }
 0x4d6   :  { %1704 = vmatpush3.msra.mxu0 %v813_v39  ;;  %v1101_v39 = vld [vmem:[#allocation2 + $0x5e0] sm:$0xff] }
 0x4d7   :  { %1705 = vmatprep.subr.mxu0 %v1867_v0 }
 0x4d8   :  { %1706 = vmatpush3.msra.mxu0 %v812_v40  ;;  %v1100_v40 = vld [vmem:[#allocation2 + $0x5d8] sm:$0xff] }
 0x4d9   :  { %1707 = vmatprep.subr.mxu0 %v1867_v0 }
 0x4da   :  { %1708 = vmatpush3.msra.mxu0 %v811_v41  ;;  %v1099_v41 = vld [vmem:[#allocation2 + $0x5d0] sm:$0xff] }
 0x4db   :  { %1709 = vmatprep.subr.mxu0 %v1867_v0 }
 0x4dc   :  { %1710 = vmatpush3.msra.mxu0 %v810_v42  ;;  %v1098_v42 = vld [vmem:[#allocation2 + $0x5c8] sm:$0xff] }
 0x4dd   :  { %1711 = vmatprep.subr.mxu0 %v1867_v0 }
 0x4de   :  { %1712 = vmatpush3.msra.mxu0 %v809_v43  ;;  %v1097_v43 = vld [vmem:[#allocation2 + $0x5c0] sm:$0xff] }
 0x4df   :  { %1713 = vmatprep.subr.mxu0 %v1867_v0 }
 0x4e0   :  { %1714 = vmatpush3.msra.mxu0 %v808_v44  ;;  %v1096_v44 = vld [vmem:[#allocation2 + $0x5b8] sm:$0xff] }
 0x4e1   :  { %1715 = vmatprep.subr.mxu0 %v1867_v0 }
 0x4e2   :  { %1716 = vmatpush3.msra.mxu0 %v807_v45  ;;  %v1095_v45 = vld [vmem:[#allocation2 + $0x5b0] sm:$0xff] }
 0x4e3   :  { %1717 = vmatprep.subr.mxu0 %v1867_v0 }
 0x4e4   :  { %1718 = vmatpush3.msra.mxu0 %v806_v46  ;;  %v1094_v46 = vld [vmem:[#allocation2 + $0x5a8] sm:$0xff] }
 0x4e5   :  { %1719 = vmatprep.subr.mxu0 %v1867_v0 }
 0x4e6   :  { %1720 = vmatpush3.msra.mxu0 %v805_v47  ;;  %v1093_v47 = vld [vmem:[#allocation2 + $0x5a0] sm:$0xff] }
 0x4e7   :  { %1721 = vmatprep.subr.mxu0 %v1867_v0 }
 0x4e8   :  { %1722 = vmatpush3.msra.mxu0 %v804_v48  ;;  %v1092_v48 = vld [vmem:[#allocation2 + $0x598] sm:$0xff] }
 0x4e9   :  { %1723 = vmatprep.subr.mxu0 %v1867_v0 }
 0x4ea   :  { %1724 = vmatpush3.msra.mxu0 %v803_v54  ;;  %v1091_v54 = vld [vmem:[#allocation2 + $0x590] sm:$0xff] }
 0x4eb   :  { %1725 = vmatprep.subr.mxu0 %v1867_v0 }
 0x4ec   :  { %1726 = vmatpush3.msra.mxu0 %v802_v55  ;;  %v1090_v55 = vld [vmem:[#allocation2 + $0x588] sm:$0xff] }
 0x4ed   :  { %1727 = vmatprep.subr.mxu0 %v1867_v0 }
 0x4ee   :  { %1728 = vmatpush3.msra.mxu0 %v801_v56  ;;  %v1089_v56 = vld [vmem:[#allocation2 + $0x580] sm:$0xff] }
 0x4ef   :  { %1767 = vmatprep.subr.mxu0 %v1867_v0 }
 0x58f   :  { %v699_v50 = vpop.f32.mrf.mxu0 }
 0x590   :  { %v700_v51 = vadd.f32 %v1202_v49, %v699_v50  ;;  %v1208_v49 = vld [vmem:[%s2161_s3 + $0x9] ss:$0 sm:$0xff] }
 0x591   :  { %v1661_v52 = vpop.f32.mrf.mxu0 }
 0x592   :  { %v703_v53 = vmax.f32 %v700_v51, 0.0 }
 0x594   :  { %1695 = vmatmul.mubr.f32.vlgmr.msra.gmra.mxu1 %v703_v53 }
 0x595   :  { %1764 = vmatprep.mubr.msk.f32.mxu1 %vm1868_vm0, %v1867_v0  ;;  %1733 = vmatpush3.msra.mxu1 %v912_v57  ;;  %v1210_v57 = vld [vmem:[%s2161_s3 + $0xa] ss:$0 sm:$0xff] }
 0x596   :  { %1734 = vmatprep.subr.mxu1 %v1867_v0 }
 0x597   :  { %1735 = vmatpush3.msra.mxu1 %v911_v58 }
 0x598   :  { %1736 = vmatprep.subr.mxu1 %v1867_v0 }
 0x599   :  { %1737 = vmatpush3.msra.mxu1 %v910_v59 }
 0x59a   :  { %1738 = vmatprep.subr.mxu1 %v1867_v0 }
 0x59b   :  { %1739 = vmatpush3.msra.mxu1 %v909_v60 }
 0x59c   :  { %1740 = vmatprep.subr.mxu1 %v1867_v0 }
 0x59d   :  { %1741 = vmatpush3.msra.mxu1 %v908_v61 }
 0x59e   :  { %1742 = vmatprep.subr.mxu1 %v1867_v0 }
 0x59f   :  { %1743 = vmatpush3.msra.mxu1 %v907_v62  ;;  %v1212_v62 = vld [vmem:[%s2161_s3 + $0xb] ss:$0 sm:$0xff] }
 0x5a0   :  { %1744 = vmatprep.subr.mxu1 %v1867_v0 }
 0x5a1   :  { %1745 = vmatpush3.msra.mxu1 %v906_v63 }
 0x5a2   :  { %1746 = vmatprep.subr.mxu1 %v1867_v0 }
 0x5a3   :  { %1747 = vmatpush3.msra.mxu1 %v905_v1 }
 0x5a4   :  { %1748 = vmatprep.subr.mxu1 %v1867_v0 }
 0x5a5   :  { %1749 = vmatpush3.msra.mxu1 %v904_v2 }
 0x5a6   :  { %1750 = vmatprep.subr.mxu1 %v1867_v0 }
 0x5a7   :  { %1751 = vmatpush3.msra.mxu1 %v903_v3 }
 0x5a8   :  { %1752 = vmatprep.subr.mxu1 %v1867_v0 }
 0x5a9   :  { %1753 = vmatpush3.msra.mxu1 %v902_v4 }
 0x5aa   :  { %1754 = vmatprep.subr.mxu1 %v1867_v0 }
 0x5ab   :  { %1755 = vmatpush3.msra.mxu1 %v901_v5 }
 0x5ac   :  { %1756 = vmatprep.subr.mxu1 %v1867_v0 }
 0x5ad   :  { %1757 = vmatpush3.msra.mxu1 %v900_v6 }
 0x5ae   :  { %1758 = vmatprep.subr.mxu1 %v1867_v0 }
 0x5af   :  { %1759 = vmatpush3.msra.mxu1 %v899_v12 }
 0x5b0   :  { %1760 = vmatprep.subr.mxu1 %v1867_v0 }
 0x5b1   :  { %1761 = vmatpush3.msra.mxu1 %v898_v13 }
 0x5b2   :  { %1762 = vmatprep.subr.mxu1 %v1867_v0 }
 0x5b3   :  { %1763 = vmatpush3.msra.mxu1 %v897_v14 }
 0x5b4   :  { %1802 = vmatprep.subr.mxu1 %v1867_v0 }
 0x654   :  { %v795_v8 = vpop.f32.mrf.mxu1 }
 0x655   :  { %v796_v9 = vadd.f32 %v1204_v7, %v795_v8 }
 0x656   :  { %v1696_v10 = vpop.f32.mrf.mxu1 }
 0x657   :  { %v799_v11 = vmax.f32 %v796_v9, 0.0 }
 0x659   :  { %1730 = vmatmul.mubr.f32.vlgmr.msra.gmra.mxu0 %v799_v11 }
 0x65a   :  { %1799 = vmatprep.mubr.msk.f32.mxu0 %vm1868_vm0, %v1867_v0  ;;  %1768 = vmatpush3.msra.mxu0 %v1008_v15 }
 0x65b   :  { %1769 = vmatprep.subr.mxu0 %v1867_v0 }
 0x65c   :  { %1770 = vmatpush3.msra.mxu0 %v1007_v16 }
 0x65d   :  { %1771 = vmatprep.subr.mxu0 %v1867_v0 }
 0x65e   :  { %1772 = vmatpush3.msra.mxu0 %v1006_v17 }
 0x65f   :  { %1773 = vmatprep.subr.mxu0 %v1867_v0 }
 0x660   :  { %1774 = vmatpush3.msra.mxu0 %v1005_v18 }
 0x661   :  { %1775 = vmatprep.subr.mxu0 %v1867_v0 }
 0x662   :  { %1776 = vmatpush3.msra.mxu0 %v1004_v19 }
 0x663   :  { %1777 = vmatprep.subr.mxu0 %v1867_v0 }
 0x664   :  { %1778 = vmatpush3.msra.mxu0 %v1003_v20 }
 0x665   :  { %1779 = vmatprep.subr.mxu0 %v1867_v0 }
 0x666   :  { %1780 = vmatpush3.msra.mxu0 %v1002_v21 }
 0x667   :  { %1781 = vmatprep.subr.mxu0 %v1867_v0 }
 0x668   :  { %1782 = vmatpush3.msra.mxu0 %v1001_v22 }
 0x669   :  { %1783 = vmatprep.subr.mxu0 %v1867_v0 }
 0x66a   :  { %1784 = vmatpush3.msra.mxu0 %v1000_v23 }
 0x66b   :  { %1785 = vmatprep.subr.mxu0 %v1867_v0 }
 0x66c   :  { %1786 = vmatpush3.msra.mxu0 %v999_v24 }
 0x66d   :  { %1787 = vmatprep.subr.mxu0 %v1867_v0 }
 0x66e   :  { %1788 = vmatpush3.msra.mxu0 %v998_v25 }
 0x66f   :  { %1789 = vmatprep.subr.mxu0 %v1867_v0 }
 0x670   :  { %1790 = vmatpush3.msra.mxu0 %v997_v26 }
 0x671   :  { %1791 = vmatprep.subr.mxu0 %v1867_v0 }
 0x672   :  { %1792 = vmatpush3.msra.mxu0 %v996_v27 }
 0x673   :  { %1793 = vmatprep.subr.mxu0 %v1867_v0 }
 0x674   :  { %1794 = vmatpush3.msra.mxu0 %v995_v33 }
 0x675   :  { %1795 = vmatprep.subr.mxu0 %v1867_v0 }
 0x676   :  { %1796 = vmatpush3.msra.mxu0 %v994_v34 }
 0x677   :  { %1797 = vmatprep.subr.mxu0 %v1867_v0 }
 0x678   :  { %1798 = vmatpush3.msra.mxu0 %v993_v35 }
 0x719   :  { %v891_v29 = vpop.f32.mrf.mxu0 }
 0x71a   :  { %v892_v30 = vadd.f32 %v1206_v28, %v891_v29 }
 0x71b   :  { %v1731_v31 = vpop.f32.mrf.mxu0 }
 0x71c   :  { %v895_v32 = vmax.f32 %v892_v30, 0.0 }
 0x71e   :  { %1765 = vmatmul.mubr.f32.vlgmr.msra.gmra.mxu1 %v895_v32 }
 0x71f   :  { %1834 = vmatprep.mubr.msk.f32.mxu1 %vm1868_vm0, %v1867_v0  ;;  %1803 = vmatpush3.msra.mxu1 %v1104_v36 }
 0x720   :  { %1804 = vmatprep.subr.mxu1 %v1867_v0 }
 0x721   :  { %1805 = vmatpush3.msra.mxu1 %v1103_v37 }
 0x722   :  { %1806 = vmatprep.subr.mxu1 %v1867_v0 }
 0x723   :  { %1807 = vmatpush3.msra.mxu1 %v1102_v38 }
 0x724   :  { %1808 = vmatprep.subr.mxu1 %v1867_v0 }
 0x725   :  { %1809 = vmatpush3.msra.mxu1 %v1101_v39 }
 0x726   :  { %1810 = vmatprep.subr.mxu1 %v1867_v0 }
 0x727   :  { %1811 = vmatpush3.msra.mxu1 %v1100_v40 }
 0x728   :  { %1812 = vmatprep.subr.mxu1 %v1867_v0 }
 0x729   :  { %1813 = vmatpush3.msra.mxu1 %v1099_v41 }
 0x72a   :  { %1814 = vmatprep.subr.mxu1 %v1867_v0 }
 0x72b   :  { %1815 = vmatpush3.msra.mxu1 %v1098_v42 }
 0x72c   :  { %1816 = vmatprep.subr.mxu1 %v1867_v0 }
 0x72d   :  { %1817 = vmatpush3.msra.mxu1 %v1097_v43 }
 0x72e   :  { %1818 = vmatprep.subr.mxu1 %v1867_v0 }
 0x72f   :  { %1819 = vmatpush3.msra.mxu1 %v1096_v44 }
 0x730   :  { %1820 = vmatprep.subr.mxu1 %v1867_v0 }
 0x731   :  { %1821 = vmatpush3.msra.mxu1 %v1095_v45 }
 0x732   :  { %1822 = vmatprep.subr.mxu1 %v1867_v0 }
 0x733   :  { %1823 = vmatpush3.msra.mxu1 %v1094_v46 }
 0x734   :  { %1824 = vmatprep.subr.mxu1 %v1867_v0 }
 0x735   :  { %1825 = vmatpush3.msra.mxu1 %v1093_v47 }
 0x736   :  { %1826 = vmatprep.subr.mxu1 %v1867_v0 }
 0x737   :  { %1827 = vmatpush3.msra.mxu1 %v1092_v48 }
 0x738   :  { %1828 = vmatprep.subr.mxu1 %v1867_v0 }
 0x739   :  { %1829 = vmatpush3.msra.mxu1 %v1091_v54 }
 0x73a   :  { %1830 = vmatprep.subr.mxu1 %v1867_v0 }
 0x73b   :  { %1831 = vmatpush3.msra.mxu1 %v1090_v55 }
 0x73c   :  { %1832 = vmatprep.subr.mxu1 %v1867_v0 }
 0x73d   :  { %1833 = vmatpush3.msra.mxu1 %v1089_v56 }
 0x7de   :  { %v987_v50 = vpop.f32.mrf.mxu1 }
 0x7df   :  { %v988_v51 = vadd.f32 %v1208_v49, %v987_v50 }
 0x7e0   :  { %v1766_v52 = vpop.f32.mrf.mxu1 }
 0x7e1   :  { %v991_v53 = vmax.f32 %v988_v51, 0.0 }
 0x7e3   :  { %1800 = vmatmul.mubr.f32.vlgmr.msra.gmra.mxu0 %v991_v53 }
 0x8a3   :  { %v1083_v58 = vpop.f32.mrf.mxu0 }
 0x8a4   :  { %v1084_v59 = vadd.f32 %v1210_v57, %v1083_v58 }
 0x8a5   :  { %v1801_v60 = vpop.f32.mrf.mxu0 }
 0x8a6   :  { %v1087_v61 = vmax.f32 %v1084_v59, 0.0 }
 0x8a8   :  { %1835 = vmatmul.mubr.f32.vlgmr.msra.gmra.mxu1 %v1087_v61 }
 0x968   :  { %v1179_v63 = vpop.f32.mrf.mxu1 }
 0x969   :  { %v1180_v1 = vadd.f32 %v1212_v62, %v1179_v63 }
 0x96a   :  { %v1836_v2 = vpop.f32.mrf.mxu1 }
 0x96b   :  { %v1183_v3 = vmax.f32 %v1180_v1, 0.0 }
 0x96d   :  { %1184 = vst [vmem:[%s2162_s4] sm:$0xff] %v1183_v3 }
 0x96e   :  { %1189 = vsyncpa [#allocation3], 1 }

</bundles_post_ra>
